<compile_context>
chip_gen: v7x
topology: tpu7x:2x2x1
jax: 0.10.0
libtpu: 0.0.40
codegen_flags: <defaults>
</compile_context>

<pallas_src>
import functools

import jax
import jax.numpy as jnp
from jax import lax
from jax.experimental import pallas as pl
from jax.experimental.pallas import tpu as pltpu

_ROW_CHUNK = 8  # sublane-aligned row chunk; keeps the live working set constant


def _gumbel_from_bits(bits, dtype):
    """uint32 random bits -> Gumbel(0,1) noise via the mantissa trick."""
    if bits.dtype != jnp.uint32:
        bits = pltpu.bitcast(bits, jnp.uint32)
    mant = lax.shift_right_logical(bits, jnp.uint32(9)) | jnp.uint32(0x3F800000)
    u = pltpu.bitcast(mant, jnp.float32) - 1.0            # Uniform[0,1)
    eps = float(jnp.finfo(jnp.float32).eps)
    u = jnp.clip(u, eps, 1.0 - eps)                       # torch clamp_probs
    u = u.astype(dtype)                                   # bf16 logs on v6e/v7x
    return -jnp.log(-jnp.log(u))


def _mask_rows(x_rows, scaled_logits, g_rows, *, inv_t, compute_dtype):
    """out = x * max_k softmax_D(scaled_logits + g/T) for one (rc, D) row chunk."""
    scores = scaled_logits[None].astype(compute_dtype) + g_rows * compute_dtype(inv_t)
    # Constant clamp instead of a per-row XLU max-reduce: with T ~ 10 the Gumbel term
    # is small and learned logits stay far below exp-overflow; the clamp documents the
    # bound (and absorbs the rare u->1 bf16 corner case).
    scores = jnp.minimum(scores, compute_dtype(80.0))
    p = jnp.exp(scores).astype(jnp.float32)                # (rc, K, D)
    l = jnp.sum(p, axis=-1, keepdims=True)                 # (rc, K, 1) f32
    s = p * (1.0 / l)                                      # exact reciprocal: l is tiny
    mask = jnp.max(s, axis=1)                              # (rc, D) max over K
    return x_rows * mask


def _concrete_mask_kernel(*refs, temperature, lr_multiplier, tb, k, d,
                          compute_dtype, in_kernel_rng):
    if in_kernel_rng:
        seed_ref, x_ref, logits_ref, o_ref = refs
        g_ref = None
    else:
        x_ref, logits_ref, g_ref, o_ref = refs

    inv_t = 1.0 / temperature
    scaled_logits = logits_ref[...] * (lr_multiplier * inv_t)   # (K, D) f32, hoisted

    rc = min(_ROW_CHUNK, tb)
    n_chunks = tb // rc

    def body(c, carry):
        r0 = c * rc
        if in_kernel_rng:
            r0 = pl.multiple_of(r0, rc)
            # Distinct, well-mixed stream per (call seed, batch block, row chunk).
            pltpu.prng_seed(seed_ref[0], pl.program_id(0), c)
            bits = pltpu.prng_random_bits((rc, k, d))
            g = _gumbel_from_bits(bits, compute_dtype)
        else:
            g = g_ref[pl.ds(r0, rc), :, :].astype(compute_dtype)
        x_rows = x_ref[pl.ds(r0, rc), :]
        out_rows = _mask_rows(x_rows, scaled_logits, g,
                              inv_t=inv_t, compute_dtype=compute_dtype)
        o_ref[pl.ds(r0, rc), :] = out_rows.astype(o_ref.dtype)
        return carry

    if n_chunks == 1:
        body(0, 0)
    else:
        lax.fori_loop(0, n_chunks, body, 0, unroll=(n_chunks <= 4))


def _default_block_rows(batch):
    # v7x has 2 TensorCores -> keep >= 2 parallel grid steps; on single-core v5e/v6e a
    # couple of fat steps amortize the ~0.35us per-step cost. Cap so VMEM stays bounded.
    if batch <= 8:
        return batch
    target = -(-batch // 2)                 # ceil(batch / 2)
    target = ((target + 7) // 8) * 8        # sublane aligned
    return min(target, 256)


def concrete_mask_forward(x, logits, seed, *, temperature=10.0, lr_multiplier=3.0,
                          block_rows=None, compute_dtype=None):
    """x: (B, D) f32, logits: (K, D) f32, seed: (1,) int32 -> (B, D) f32."""
    B, D = x.shape
    K, D2 = logits.shape
    assert D2 == D

    on_tpu = jax.default_backend() == "tpu"
    if compute_dtype is None:
        kind = jax.devices()[0].device_kind.lower() if on_tpu else ""
        # bf16 EUP exists on v6e/v7x; v5e (and CPU interpret) keep f32.
        compute_dtype = jnp.float32 if (not on_tpu or "v5" in kind) else jnp.bfloat16

    tb = int(block_rows) if block_rows is not None else _default_block_rows(B)
    tb = max(1, min(tb, B))
    if tb < B:                               # non-full blocks must be 8-row aligned
        tb = max(8, (tb // 8) * 8)
        tb = min(tb, B)
    grid = (pl.cdiv(B, tb),)                 # partial last block masked by Pallas

    kernel = functools.partial(
        _concrete_mask_kernel,
        temperature=float(temperature), lr_multiplier=float(lr_multiplier),
        tb=tb, k=K, d=D, compute_dtype=compute_dtype, in_kernel_rng=on_tpu)

    out_shape = jax.ShapeDtypeStruct((B, D), x.dtype)
    x_spec = pl.BlockSpec((tb, D), lambda b, *_: (b, 0))
    logits_spec = pl.BlockSpec((K, D), lambda b, *_: (0, 0))
    out_spec = pl.BlockSpec((tb, D), lambda b, *_: (b, 0))

    if on_tpu:
        # In-kernel hardware PRNG: the (B, K, D) noise tensor never touches HBM.
        return pl.pallas_call(
            kernel,
            out_shape=out_shape,
            grid_spec=pltpu.PrefetchScalarGridSpec(
                num_scalar_prefetch=1,                 # seed lands in SMEM
                grid=grid,
                in_specs=[x_spec, logits_spec],
                out_specs=out_spec),
            compiler_params=pltpu.CompilerParams(
                dimension_semantics=("parallel",),     # shards batch blocks across TCs
                vmem_limit_bytes=32 * 1024 * 1024),
        )(seed, x, logits)

    # TODO(synk): pltpu.prng_* has no CPU/interpret lowering; off-TPU we precompute the
    # Gumbel noise with jax.random and stream it through a (tb, K, D) block instead.
    g = jax.random.gumbel(jax.random.PRNGKey(seed[0]), (B, K, D), dtype=jnp.float32)
    return pl.pallas_call(
        kernel,
        out_shape=out_shape,
        grid=grid,
        in_specs=[x_spec, logits_spec,
                  pl.BlockSpec((tb, K, D), lambda b, *_: (b, 0, 0))],
        out_specs=out_spec,
    )(x, logits, g)


if __name__ == "__main__":
    # Small shapes consistent with the module: 128 features, k=16 selected, batch=16
    # (two 8-row blocks -> 2 grid steps: parallel on v7x, 2 short serial steps on v5e/v6e).
    batch, input_size, k = 16, 128, 16
    temperature, lr_multiplier = 10.0, 3.0

    root = jax.random.PRNGKey(0)
    key_x, key_logits = jax.random.split(root)
    x = jax.random.normal(key_x, (batch, input_size), dtype=jnp.float32)
    # Module __init__ uses zero logits; small non-zero values exercise the logits path.
    logits = 0.1 * jax.random.normal(key_logits, (k, input_size), dtype=jnp.float32)
    seed = jnp.array([1234], dtype=jnp.int32)

    out = jax.block_until_ready(
        concrete_mask_forward(x, logits, seed,
                              temperature=temperature, lr_multiplier=lr_multiplier))
    assert out.shape == (batch, input_size)
    assert bool(jnp.all(jnp.isfinite(out)))

    # Noise is drawn stochastically (in-kernel on TPU), so instead of a bit-exact
    # reference we verify the structural invariants of out = x * max_k(softmax rows):
    #   0 < M <= 1   and   1 <= sum_d M[b, d] <= k.
    safe_x = jnp.where(x == 0.0, 1.0, x)
    m_rec = jnp.where(x == 0.0, 0.5, out / safe_x)       # recover M = out / x
    assert bool(jnp.all(m_rec > 0.0))
    assert bool(jnp.all(m_rec <= 1.0 + 1e-2))
    row_sum = jnp.sum(m_rec, axis=-1)
    assert bool(jnp.all(row_sum >= 1.0 - 5e-2))
    assert bool(jnp.all(row_sum <= k + 5e-2))

    # Deterministic for a fixed seed; a different seed gives a different mask.
    out2 = jax.block_until_ready(
        concrete_mask_forward(x, logits, seed,
                              temperature=temperature, lr_multiplier=lr_multiplier))
    assert bool(jnp.all(out == out2))
    out3 = jax.block_until_ready(
        concrete_mask_forward(x, logits, jnp.array([999], dtype=jnp.int32),
                              temperature=temperature, lr_multiplier=lr_multiplier))
    assert not bool(jnp.all(out == out3))

    print("KERNEL_OK")
</pallas_src>

<mosaic_0001>
module attributes {stable_mosaic.version = 11 : i64} {
  func.func @_concrete_mask_kernel(%arg0: i32, %arg1: memref<8x128xf32, #tpu.memory_space<vmem>>, %arg2: memref<16x128xf32, #tpu.memory_space<vmem>>, %arg3: memref<8x16x128xf32, #tpu.memory_space<vmem>>, %arg4: memref<8x128xf32, #tpu.memory_space<vmem>>) attributes {dimension_semantics = [#tpu.dimension_semantics<arbitrary>], iteration_bounds = array<i64: 2>, scalar_prefetch = 0 : i64, scratch_operands = 0 : i64, tpu.core_type = #tpu.core_type<tc>, window_params = [{transform_indices = @transform_0, window_bounds = array<i64: 8, 128>}, {pipeline_mode = #tpu.pipeline_mode<synchronous>, transform_indices = @transform_1, window_bounds = array<i64: 16, 128>}, {transform_indices = @transform_2, window_bounds = array<i64: 8, 16, 128>}, {transform_indices = @transform_3, window_bounds = array<i64: 8, 128>}]} {
    %c0 = arith.constant 0 : index
    %c0_0 = arith.constant 0 : index
    %0 = vector.load %arg2[%c0, %c0_0] : memref<16x128xf32, #tpu.memory_space<vmem>>, vector<16x128xf32>
    %cst = arith.constant 3.000000e-01 : f32
    %1 = vector.broadcast %cst : f32 to vector<16x128xf32>
    %2 = arith.mulf %0, %1 : vector<16x128xf32>
    %c0_1 = arith.constant 0 : index
    %c0_2 = arith.constant 0 : index
    %c0_3 = arith.constant 0 : index
    %3 = vector.load %arg3[%c0_1, %c0_2, %c0_3] : memref<8x16x128xf32, #tpu.memory_space<vmem>>, vector<8x16x128xf32>
    %c0_4 = arith.constant 0 : index
    %c0_5 = arith.constant 0 : index
    %4 = vector.load %arg1[%c0_4, %c0_5] : memref<8x128xf32, #tpu.memory_space<vmem>>, vector<8x128xf32>
    %5 = vector.shape_cast %2 : vector<16x128xf32> to vector<1x16x128xf32>
    %cst_6 = arith.constant 1.000000e-01 : f32
    %6 = vector.broadcast %cst_6 : f32 to vector<8x16x128xf32>
    %7 = arith.mulf %3, %6 : vector<8x16x128xf32>
    %8 = vector.broadcast %5 : vector<1x16x128xf32> to vector<8x16x128xf32>
    %9 = arith.addf %8, %7 : vector<8x16x128xf32>
    %cst_7 = arith.constant 8.000000e+01 : f32
    %10 = vector.broadcast %cst_7 : f32 to vector<8x16x128xf32>
    %11 = arith.minimumf %9, %10 : vector<8x16x128xf32>
    %12 = math.exp %11 : vector<8x16x128xf32>
    %cst_8 = arith.constant dense<0.000000e+00> : vector<8x16xf32>
    %13 = vector.multi_reduction <add>, %12, %cst_8 [2] : vector<8x16x128xf32> to vector<8x16xf32>
    %14 = vector.shape_cast %13 : vector<8x16xf32> to vector<8x16x1xf32>
    %cst_9 = arith.constant 1.000000e+00 : f32
    %15 = vector.broadcast %cst_9 : f32 to vector<8x16x1xf32>
    %16 = arith.divf %15, %14 : vector<8x16x1xf32>
    %17 = vector.broadcast %16 : vector<8x16x1xf32> to vector<8x16x128xf32>
    %18 = arith.mulf %12, %17 : vector<8x16x128xf32>
    %cst_10 = arith.constant dense<0xFF800000> : vector<8x128xf32>
    %19 = vector.multi_reduction <maximumf>, %18, %cst_10 [1] : vector<8x16x128xf32> to vector<8x128xf32>
    %20 = arith.mulf %4, %19 : vector<8x128xf32>
    %c0_11 = arith.constant 0 : index
    %c0_12 = arith.constant 0 : index
    %21 = vector.load %arg4[%c0_11, %c0_12] : memref<8x128xf32, #tpu.memory_space<vmem>>, vector<8x128xf32>
    tpu.vector_store %arg4[%c0_11, %c0_12], %20 {strides = array<i32>} : memref<8x128xf32, #tpu.memory_space<vmem>>, vector<8x128xf32>,
    return
  }
  func.func @transform_0(%arg0: i32) -> (i32, i32) {
    %c0_i32 = arith.constant 0 : i32
    %c0_i32_0 = arith.constant 0 : i32
    return %arg0, %c0_i32 : i32, i32
  }
  func.func @transform_1(%arg0: i32) -> (i32, i32) {
    %c0_i32 = arith.constant 0 : i32
    %c0_i32_0 = arith.constant 0 : i32
    %c0_i32_1 = arith.constant 0 : i32
    return %c0_i32, %c0_i32_0 : i32, i32
  }
  func.func @transform_2(%arg0: i32) -> (i32, i32, i32) {
    %c0_i32 = arith.constant 0 : i32
    %c0_i32_0 = arith.constant 0 : i32
    %c0_i32_1 = arith.constant 0 : i32
    return %arg0, %c0_i32, %c0_i32_0 : i32, i32, i32
  }
  func.func @transform_3(%arg0: i32) -> (i32, i32) {
    %c0_i32 = arith.constant 0 : i32
    %c0_i32_0 = arith.constant 0 : i32
    return %arg0, %c0_i32 : i32, i32
  }
}

</mosaic_0001>

<bundles_post_ra>
// kernel: tpu_custom_call.1
= control target key start
LH: loop header
LB: loop body
LE: loop exit
PB: predicated region body
PF: predicated region fallthrough
CT: control target
= control target key end

     0   :  { %8 = vsyncpa [#allocation3], 0  ;;  %s1308_s0 = inlined_call_operand.hbm [shape: f32[16,128], index: 0, kind: input, shape index: {}]   ;;  %s1309_s1 = inlined_call_operand.hbm [shape: f32[16,128], index: 1, kind: input, shape index: {}]   ;;  %s1310_s2 = inlined_call_operand.hbm [shape: f32[16,16,128], index: 2, kind: input, shape index: {}]   ;;  %s1311_s3 = inlined_call_operand.hbm [shape: f32[16,128], index: 3, kind: output, shape index: {}]  }
   0x1   :  { %10 = vsyncpa [#allocation3 + $0x1], 0 }
   0x2   :  { %11 = vsyncpa [#allocation6], 0 }
   0x3   :  { %12 = vsyncpa [#allocation4], 0 }
   0x4   :  { %14 = vsyncpa [#allocation4 + $0x1], 0  ;;  %s955_s12 = smov 0   ;;  %s957_s13 = smov 0  }
   0x5   :  { %s959_s14 = smov 0   ;;  %s961_s15 = smov 0  }
   0x6 LB: > { %s976_s16 = sadd.s32 1, %s927_s15   ;;  %s27_s17 = sadd.s32 1, %s923_s14  ;;  %s927_s15 = sphi %s961_s15, %s1332_s15   ;;  %s923_s14 = sphi %s959_s14, %s1331_s14   ;;  %s919_s13 = sphi %s957_s13, %s1330_s13   ;;  %s915_s12 = sphi %s955_s12, %s1329_s12  }
   0x7   : > { %s24_s18 = ssub.s32 %s927_s15, %s976_s16  ;;  %p34_p0 = scmp.ne.s32.totalorder %s923_s14, %s919_s13 }
   0x8   : > { %p25_p1 = scmp.eq.s32.totalorder %s24_s18, 0  ;;  %p35_p2 = scmp.eq.s32.totalorder %s927_s15, 0 }
   0x9   : > { %p663_p4 = scmp.lt.s32.totalorder %s927_s15, 2  ;;  %s150_s20 = sand.u32 1, %s927_s15  }
   0xa   : > { %s987_s19 = scalar_select %p25_p1, %s923_s14, %s27_s17  }
   0xb   : > { %p36_p5 = por %p35_p2, %p34_p0  ;;  %s152_s21 = sand.u32 1, %s923_s14  }
   0xc   : > { %s620_s22 = sshll.u32 %s152_s21, 3  ;;  %s621_s23 = sshll.u32 %s927_s15, 7 }
   0xd   : > { %s998_s26 = scalar_lea.hbm %s1308_s0, %s621_s23  ;;  %s154_s27 = scalar_lea.vmem [#allocation2], %s620_s22 }
   0xe   : > { %s161_s28 = sshll.u32 %s154_s27, 4  ;;  %p1000_p6 = pnand %p663_p4, %p36_p5  ;;  %s1004_s28 = int_to_ptr.vmem [resolvable:$true] %s161_s28 }
   0xf   : > { %s1006_s30 = sshll.u32 %s152_s21, 7  ;;  %s1008_s4 = scalar_lea.sflag [#allocation3], %s150_s20 }
  0x10   : > { %s765_s5 = scalar_lea.hbm %s998_s26, 128  ;;  %p767_p8 = pneg %p1000_p6 }
  0x11   : > { %p766_p7 = scmp.ne.s32.totalorder %s998_s26, %s765_s5  ;;  %s770_s8 = scalar_lea.hbm %s1308_s0, 256 }
  0x12   : > { %p771_p11 = scmp.lt.u32.totalorder %s998_s26, %s1308_s0  ;;  %p772_p12 = scmp.lt.u32.totalorder %s770_s8, %s765_s5 }
  0x13   : > { %p768_p9 = pnand %p767_p8, %p766_p7  ;;  %p774_p1 = scmp.lt.u32.totalorder %s765_s5, %s998_s26 }
  0x14   : > { %p773_p13 = por %p772_p12, %p771_p11 }
  0x15   : > { %p769_p10 = pneg %p768_p9 }
  0x16   : > { %p775_p2 = por %p774_p1, %p773_p13 }
  0x18   : > { %p776_p4 = pnand %p775_p2, %p769_p10 }
  0x1a   : > { %779 = shalt.err (!%p776_p4)
}
  0x1b   : > { %s780_s11 = scalar_lea.vmem %s1004_s28, 128  ;;  %s929_s17 = smov [#allocation2]  }
  0x1c   : > { %p781_p5 = scmp.ne.s32.totalorder %s1004_s28, %s780_s11  ;;  %s785_s18 = sshll.u32 %s929_s17, 4  ;;  %s786_s18 = int_to_ptr.vmem [resolvable:$false] %s785_s18 }
  0x1d   : > { %s787_s20 = scalar_lea.vmem %s786_s18, 256  ;;  %p788_p3 = scmp.lt.s32.totalorder %s1004_s28, %s786_s18 }
  0x1e   : > { %p783_p7 = pnand %p781_p5, %p767_p8  ;;  %p789_p11 = scmp.lt.s32.totalorder %s787_s20, %s780_s11 }
  0x20   : > { %p784_p9 = pneg %p783_p7  ;;  %p790_p12 = por %p789_p11, %p788_p3 }
  0x22   : > { %p791_p13 = pnand %p790_p12, %p784_p9 }
  0x24   : > { %794 = shalt.err (!%p791_p13)
}
  0x25   : > { %654 = dma.hbm_to_vmem [thread:$0]  (!%p1000_p6), %s998_s26, 128, %s1004_s28, %s1008_s4  }
  0x26   : > { %s172_s21 = scalar_lea.vmem [#allocation7], %s1006_s30  ;;  %s1038_s23 = sadd.s32 4294967295, %s927_s15  }
  0x27   : > { %s180_s22 = sshll.u32 %s172_s21, 4  ;;  %s616_s24 = sadd.s32 4294967294, %s927_s15   ;;  %s1064_s22 = int_to_ptr.vmem [resolvable:$true] %s180_s22 }
  0x28   : > { %p40_p3 = scmp.ne.s32.totalorder %s919_s13, %s915_s12  ;;  %p1312_p10 = scmp.eq.s32.totalorder %s1038_s23, 0 }
  0x29   : > { %p111_p1 = scmp.eq.s32.totalorder %s1038_s23, 1  ;;  %p117_p2 = scmp.eq.s32.totalorder %s616_s24, 1 }
  0x2a   : > { %p1047_p4 = por %p1312_p10, %p40_p3  ;;  %p617_p5 = scmp.ge.s32.totalorder %s927_s15, 1 }
  0x2b   : > { %p1055_p7 = por %p111_p1, %p34_p0  ;;  %p1059_p9 = por %p117_p2, %p40_p3 }
  0x2c   : > { %s1317_s25 = scalar_select %p1047_p4, 1, 0 }
  0x2d   : > { %s1318_s26 = scalar_select %p1055_p7, 1, 0 }
  0x2e   : > { %s1319_s27 = scalar_select %p1059_p9, 1, 0 }
  0x2f   : > { %p124_p11 = scmp.lt.s32.totalorder %s927_s15, 3  ;;  %s930_s30 = smov [#allocation5]  }
  0x30   : > { %s136_s5 = sshll.u32 %s930_s30, 4  ;;  %s636_s6 = sshll.u32 %s927_s15, 11  ;;  %s1078_s5 = int_to_ptr.vmem [resolvable:$true] %s136_s5 }
  0x31   : > { %p1066_p12 = pnand %p617_p5, %p124_p11  ;;  %s1076_s9 = scalar_lea.hbm %s1310_s2, %s636_s6 }
  0x32   : > { %s795_s11 = scalar_lea.hbm %s1076_s9, 2048  ;;  %s800_s20 = scalar_lea.hbm %s1310_s2, 4096 }
  0x33   : > { %s1320_s28 = scalar_select %p1066_p12, 1, 0 }
  0x34   : > { %p647_p13 = pneg %p1066_p12  ;;  %p796_p3 = scmp.ne.s32.totalorder %s1076_s9, %s795_s11 }
  0x35   : > { %p801_p5 = scmp.lt.u32.totalorder %s1076_s9, %s1310_s2  ;;  %p802_p11 = scmp.lt.u32.totalorder %s800_s20, %s795_s11 }
  0x36   : > { %p1082_p0 = pnand %p647_p13, %p1312_p10  ;;  %p798_p1 = pnand %p796_p3, %p767_p8 }
  0x37   : > { %p803_p9 = por %p802_p11, %p801_p5  ;;  %p804_p13 = scmp.lt.u32.totalorder %s795_s11, %s1076_s9 }
  0x38   : > { %p799_p2 = pneg %p798_p1 }
  0x39   : > { %p805_p10 = por %p804_p13, %p803_p9 }
  0x3b   : > { %p806_p7 = pnand %p805_p10, %p799_p2 }
  0x3d   : > { %809 = shalt.err (!%p806_p7)
}
  0x3e   : > { %s810_s30 = scalar_lea.vmem %s1064_s22, 2048  ;;  %s931_s6 = smov [#allocation7]  }
  0x3f   : > { %p811_p3 = scmp.ne.s32.totalorder %s1064_s22, %s810_s30  ;;  %s815_s7 = sshll.u32 %s931_s6, 4  ;;  %s816_s7 = int_to_ptr.vmem [resolvable:$false] %s815_s7 }
  0x40   : > { %s817_s8 = scalar_lea.vmem %s816_s7, 4096  ;;  %p818_p12 = scmp.lt.s32.totalorder %s1064_s22, %s816_s7 }
  0x41   : > { %p813_p1 = pnand %p811_p3, %p767_p8  ;;  %p819_p5 = scmp.lt.s32.totalorder %s817_s8, %s810_s30 }
  0x43   : > { %p814_p4 = pneg %p813_p1  ;;  %p820_p11 = por %p819_p5, %p818_p12 }
  0x45   : > { %p821_p9 = pnand %p820_p11, %p814_p4 }
  0x47   : > { %824 = shalt.err (!%p821_p9)
}
  0x48   : > { %s932_s11 = smov 128   ;;  %s933_s17 = smov 8  }
  0x49   : > { %657 = dma.hbm_to_vmem [thread:$0]  (!%p1000_p6), %s1076_s9, 2048, %s1064_s22, %s1008_s4, %s932_s11, %s932_s11, %s933_s17  }
  0x4a   : > { %s825_s21 = scalar_lea.hbm %s1309_s1, 256  ;;  %p827_p10 = pneg %p1082_p0 }
  0x4b   : > { %p826_p8 = scmp.ne.s32.totalorder %s1309_s1, %s825_s21  ;;  %p832_p12 = scmp.lt.u32.totalorder %s825_s21, %s1309_s1 }
  0x4d   : > { %p828_p4 = pnand %p827_p10, %p826_p8 }
  0x4f   : > { %p829_p7 = pneg %p828_p4 }
  0x51   : > { %p834_p2 = pnand %p832_p12, %p829_p7 }
  0x53   : > { %837 = shalt.err (!%p834_p2)
}
  0x54   : > { %s838_s29 = scalar_lea.vmem %s1078_s5, 256  ;;  %p846_p1 = scmp.lt.s32.totalorder %s1078_s5, %s1078_s5 }
  0x55   : > { %p839_p6 = scmp.ne.s32.totalorder %s1078_s5, %s838_s29  ;;  %p847_p5 = scmp.lt.s32.totalorder %s838_s29, %s838_s29 }
  0x57   : > { %p841_p13 = pnand %p839_p6, %p827_p10  ;;  %p848_p11 = por %p847_p5, %p846_p1 }
  0x59   : > { %p842_p3 = pneg %p841_p13 }
  0x5b   : > { %p849_p9 = pnand %p848_p11, %p842_p3 }
  0x5d   : > { %852 = shalt.err (!%p849_p9)
}
  0x5e   : > { %650 = dma.hbm_to_vmem [thread:$0]  (!%p1082_p0), %s1309_s1, 256, %s1078_s5, [#allocation6], %s932_s11, %s932_s11, %s933_s17  }
  0x5f   : > { %p1322_p8 = scmp.ne.s32.totalorder %s1320_s28, 0 }
  0x60   : > { %s194_s9 = sand.u32 (!%p1322_p8), 1, %s1038_s23   ;;  %s1135_s8 = sand.u32 (!%p1322_p8), 1, %s919_s13  }
  0x61   : > { %192 = sbr.rel (%p1322_p8) target bundleno = 347 (0x15b), region = 32  ;;  %s627_s18 = sshll.u32 (!%p1322_p8), %s1135_s8, 3 }
  0x62   : > { %s195_s20 = scalar_lea.sflag (!%p1322_p8), [#allocation3], %s194_s9  ;;  %s1140_s10 = scalar_lea.vmem (!%p1322_p8), [#allocation2], %s627_s18 }
  0x63   : > { %p1323_p10 = scmp.ne.s32.totalorder (!%p1322_p8), %s1317_s25, 0 }
  0x68   : > { %898 = dma.done.wait (%p1323_p10), %s195_s20, 128  }
  0x69   : > { %900 = vsyncadd (%p1323_p10), %s195_s20, 4294967168  ;;  %p1324_p0 = scmp.eq.s32.totalorder %s1038_s23, 0 }
  0x6b   : > { %902 = dma.done.wait (%p1324_p0), [#allocation6], 256   ;;  %p1325_p4 = pmov %p1324_p0 }
  0x6c   : > { %s629_s28 = sshll.u32 %s1135_s8, 7 }
  0x6d   : > { %904 = vsyncadd (%p1325_p4), [#allocation6], 4294967040  ;;  %s1151_s5 = scalar_lea.vmem [#allocation7], %s629_s28 }
  0x6e   : > { %906 = dma.done.wait (%p1323_p10), %s195_s20, 2048  }
  0x6f   : > { %908 = vsyncadd (%p1323_p10), %s195_s20, 4294965248  ;;  %v240_v0 = vld [vmem:[#allocation5] sm:$0xff]  ;;  %v244_v2 = vld [vmem:[%s1151_s5] sm:$0xff]  ;;  %vm485_vm0 = vcmask 1041409   ;;  %vm487_vm1 = vcmask 1042434   ;;  %vm489_vm2 = vcmask 1043459  }
  0x70   : > { %v246_v1 = vld [vmem:[%s1151_s5 + $0x10] sm:$0xff]  ;;  %v1159_v3 = vmul.f32 0.3, %v240_v0  ;;  %v261_v5 = vmul.f32 0.1, %v244_v2  ;;  %v241_v6 = vld [vmem:[#allocation5 + $0x8] sm:$0xff] }
  0x71   : > { %v263_v4 = vmul.f32 0.1, %v246_v1  ;;  %v247_v7 = vld [vmem:[%s1151_s5 + $0x18] sm:$0xff]  ;;  %v245_v8 = vld [vmem:[%s1151_s5 + $0x8] sm:$0xff]  ;;  %v1165_v11 = vmul.f32 0.3, %v241_v6 }
  0x72   : > { %v277_v10 = vadd.f32 %v261_v5, %v1159_v3  ;;  %v264_v12 = vmul.f32 0.1, %v247_v7  ;;  %v249_v13 = vld [vmem:[%s1151_s5 + $0x28] sm:$0xff]  ;;  %v248_v14 = vld [vmem:[%s1151_s5 + $0x20] sm:$0xff]  ;;  %v262_v15 = vmul.f32 0.1, %v245_v8 }
  0x73   : > { %v279_v9 = vadd.f32 %v263_v4, %v1159_v3  ;;  %v266_v16 = vmul.f32 0.1, %v249_v13  ;;  %v265_v17 = vmul.f32 0.1, %v248_v14  ;;  %v251_v21 = vld [vmem:[%s1151_s5 + $0x38] sm:$0xff]  ;;  %v250_v26 = vld [vmem:[%s1151_s5 + $0x30] sm:$0xff] }
  0x74   : > { %v293_v19 = vmin.f32 %v277_v10, 80.0  ;;  %v280_v20 = vadd.f32 %v264_v12, %v1165_v11  ;;  %v278_v22 = vadd.f32 %v262_v15, %v1165_v11  ;;  %v268_v25 = vmul.f32 0.1, %v251_v21  ;;  %v253_v27 = vld [vmem:[%s1151_s5 + $0x48] sm:$0xff]  ;;  %v252_v35 = vld [vmem:[%s1151_s5 + $0x40] sm:$0xff]  ;;  %v255_v36 = vld [vmem:[%s1151_s5 + $0x58] sm:$0xff] }
  0x75   : > { %v295_v18 = vmin.f32 %v279_v9, 80.0  ;;  %v282_v23 = vadd.f32 %v266_v16, %v1165_v11  ;;  %v281_v24 = vadd.f32 %v265_v17, %v1159_v3  ;;  %v254_v37 = vld [vmem:[%s1151_s5 + $0x50] sm:$0xff]  ;;  %v267_v39 = vmul.f32 0.1, %v250_v26  ;;  %v257_v47 = vld [vmem:[%s1151_s5 + $0x68] sm:$0xff]  ;;  %v256_v52 = vld [vmem:[%s1151_s5 + $0x60] sm:$0xff] }
  0x76   : > { %v309_v29 = vmul.f32 1.442695, %v293_v19  ;;  %v296_v30 = vmin.f32 %v280_v20, 80.0  ;;  %v294_v31 = vmin.f32 %v278_v22, 80.0  ;;  %v284_v34 = vadd.f32 %v268_v25, %v1165_v11  ;;  %v259_v62 = vld [vmem:[%s1151_s5 + $0x78] sm:$0xff]  ;;  %v258_v63 = vld [vmem:[%s1151_s5 + $0x70] sm:$0xff] }
  0x77   : > { %v313_v28 = vmul.f32 1.442695, %v295_v18  ;;  %v298_v32 = vmin.f32 %v282_v23, 80.0  ;;  %v297_v33 = vmin.f32 %v281_v24, 80.0  ;;  %v270_v40 = vmul.f32 0.1, %v253_v27 }
  0x78   : > { %v315_v38 = vmul.f32 1.442695, %v296_v30  ;;  %v311_v41 = vmul.f32 1.442695, %v294_v31  ;;  %v300_v44 = vmin.f32 %v284_v34, 80.0  ;;  %v283_v45 = vadd.f32 %v267_v39, %v1159_v3  ;;  %s632_s25 = sshll.u32 %s1038_s23, 7 }
  0x79   : > { %701 = vpow2.f32 %v313_v28  ;;  %v319_v42 = vmul.f32 1.442695, %v298_v32  ;;  %v317_v43 = vmul.f32 1.442695, %v297_v33  ;;  %v286_v46 = vadd.f32 %v270_v40, %v1165_v11  ;;  %s238_s11 = scalar_lea.vmem [#allocation8], %s627_s18  ;;  %s1264_s6 = scalar_lea.hbm %s1311_s3, %s632_s25 }
  0x7a   : > { %703 = vpow2.f32 %v309_v29  ;;  %v269_v48 = vmul.f32 0.1, %v252_v35  ;;  %v272_v49 = vmul.f32 0.1, %v255_v36  ;;  %v271_v50 = vmul.f32 0.1, %v254_v37 }
  0x7b   : > { %705 = vpow2.f32 %v315_v38  ;;  %v299_v51 = vmin.f32 %v283_v45, 80.0  ;;  %v323_v53 = vmul.f32 1.442695, %v300_v44  ;;  %v302_v54 = vmin.f32 %v286_v46, 80.0  ;;  %s516_s17 = sshll.u32 %s238_s11, 4  ;;  %s503_s30 = scalar_lea.sflag [#allocation4], %s1135_s8  ;;  %s1266_s17 = int_to_ptr.vmem [resolvable:$true] %s516_s17 }
  0x7c   : > { %707 = vpow2.f32 %v311_v41  ;;  %v285_v55 = vadd.f32 %v269_v48, %v1159_v3  ;;  %v288_v56 = vadd.f32 %v272_v49, %v1165_v11  ;;  %v287_v57 = vadd.f32 %v271_v50, %v1159_v3  ;;  %s853_s7 = scalar_lea.vmem %s1266_s17, 128  ;;  %p1326_p12 = scmp.ne.s32.totalorder %s1318_s26, 0 }
  0x7d   : > { %709 = vpow2.f32 %v319_v42  ;;  %v274_v58 = vmul.f32 0.1, %v257_v47  ;;  %v321_v59 = vmul.f32 1.442695, %v299_v51  ;;  %v273_v61 = vmul.f32 0.1, %v256_v52  ;;  %p854_p7 = scmp.ne.s32.totalorder %s1266_s17, %s853_s7 }
  0x7e   : > { %711 = vpow2.f32 %v317_v43  ;;  %v301_v60 = vmin.f32 %v285_v55, 80.0  ;;  %v327_v0 = vmul.f32 1.442695, %v302_v54  ;;  %v304_v2 = vmin.f32 %v288_v56, 80.0  ;;  %s934_s23 = smov [#allocation8]  }
  0x7f   : > { %713 = vpow2.f32 %v323_v53  ;;  %v303_v4 = vmin.f32 %v287_v57, 80.0  ;;  %v290_v5 = vadd.f32 %v274_v58, %v1165_v11  ;;  %v276_v6 = vmul.f32 0.1, %v259_v62  ;;  %p855_p2 = pnand %p854_p7, %p1326_p12  ;;  %s857_s29 = sshll.u32 %s934_s23, 4  ;;  %s858_s29 = int_to_ptr.vmem [resolvable:$false] %s857_s29 }
  0x80   : > { %715 = vpow2.f32 %v321_v59  ;;  %v325_v8 = vmul.f32 1.442695, %v301_v60  ;;  %v289_v9 = vadd.f32 %v273_v61, %v1159_v3  ;;  %v275_v10 = vmul.f32 0.1, %v258_v63  ;;  %s859_s4 = scalar_lea.vmem %s858_s29, 256  ;;  %p860_p13 = scmp.lt.s32.totalorder %s1266_s17, %s858_s29 }
  0x81   : > { %717 = vpow2.f32 %v327_v0  ;;  %v331_v14 = vmul.f32 1.442695, %v304_v2  ;;  %v306_v15 = vmin.f32 %v290_v5, 80.0  ;;  %v292_v16 = vadd.f32 %v276_v6, %v1165_v11  ;;  %p856_p6 = pneg %p855_p2  ;;  %p861_p3 = scmp.lt.s32.totalorder %s859_s4, %s853_s7 }
  0x82   : > { %719 = vpow2.f32 %v325_v8  ;;  %v329_v17 = vmul.f32 1.442695, %v303_v4  ;;  %v305_v18 = vmin.f32 %v289_v9, 80.0  ;;  %v291_v19 = vadd.f32 %v275_v10, %v1159_v3 }
  0x83   : > { %v1189_v1 = vpop.eup %701  ;;  %721 = vpow2.f32 %v331_v14  ;;  %v335_v22 = vmul.f32 1.442695, %v306_v15  ;;  %v308_v23 = vmin.f32 %v292_v16, 80.0  ;;  %vm491_vm3 = vcmask 1044484   ;;  %p862_p1 = por %p861_p3, %p860_p13 }
  0x84   : > { %v1192_v7 = vpop.eup %703  ;;  %345 = vadd.xlane.f32.xlu1 %v1189_v1  ;;  %723 = vpow2.f32 %v329_v17  ;;  %v333_v11 = vmul.f32 1.442695, %v305_v18  ;;  %v307_v25 = vmin.f32 %v291_v19, 80.0  ;;  %vm493_vm4 = vcmask 1045509  }
  0x85   : > { %v1196_v12 = vpop.eup %705  ;;  %341 = vadd.xlane.f32.xlu0 %v1192_v7  ;;  %725 = vpow2.f32 %v335_v22  ;;  %v339_v3 = vmul.f32 1.442695, %v308_v23  ;;  %vm495_vm5 = vcmask 1046534   ;;  %vm497_vm6 = vcmask 1047559   ;;  %p863_p5 = pnand %p862_p1, %p856_p6 }
  0x86   : > { %v1199_v13 = vpop.eup %707  ;;  %727 = vpow2.f32 %v333_v11  ;;  %v337_v27 = vmul.f32 1.442695, %v307_v25 }
  0x87   : > { %v1204_v20 = vpop.eup %709  ;;  %729 = vpow2.f32 %v339_v3 }
  0x88   : > { %347 = vadd.xlane.f32.xlu1 %v1196_v12  ;;  %v1207_v21 = vpop.eup %711  ;;  %731 = vpow2.f32 %v337_v27 }
  0x89   : > { %343 = vadd.xlane.f32.xlu0 %v1199_v13  ;;  %v1209_v24 = vpop.eup %713 }
  0x8a   : > { %v1213_v26 = vpop.eup %715 }
  0x8b   : > { %v1216_v28 = vpop.eup %717 }
  0x8c   : > { %351 = vadd.xlane.f32.xlu1 %v1204_v20  ;;  %v1219_v29 = vpop.eup %719 }
  0x8d   : > { %349 = vadd.xlane.f32.xlu0 %v1207_v21  ;;  %v1222_v30 = vpop.eup %721 }
  0x8e   : > { %v1225_v31 = vpop.eup %723 }
  0x8f   : > { %v1228_v32 = vpop.eup %725 }
  0x90   : > { %355 = vadd.xlane.f32.xlu1 %v1209_v24  ;;  %v1231_v33 = vpop.eup %727 }
  0x91   : > { %353 = vadd.xlane.f32.xlu0 %v1213_v26  ;;  %v1234_v34 = vpop.eup %729 }
  0x92   : > { %v1237_v35 = vpop.eup %731 }
  0x94   : > { %359 = vadd.xlane.f32.xlu1 %v1216_v28 }
  0x95   : > { %357 = vadd.xlane.f32.xlu0 %v1219_v29 }
  0x98   : > { %363 = vadd.xlane.f32.xlu1 %v1222_v30 }
  0x99   : > { %361 = vadd.xlane.f32.xlu0 %v1225_v31 }
  0x9c   : > { %367 = vadd.xlane.f32.xlu1 %v1228_v32 }
  0x9d   : > { %365 = vadd.xlane.f32.xlu0 %v1231_v33 }
  0xa0   : > { %371 = vadd.xlane.f32.xlu1 %v1234_v34 }
  0xa1   : > { %369 = vadd.xlane.f32.xlu0 %v1237_v35 }
 0x111   : > { %v346_v36 = vpop.xlane.xlu1 %345 }
 0x112   : > { %v342_v37 = vpop.xlane.xlu0 %341  ;;  %733 = vrcp.f32 %v346_v36 }
 0x113   : > { %735 = vrcp.f32 %v342_v37 }
 0x115   : > { %v348_v38 = vpop.xlane.xlu1 %347 }
 0x116   : > { %v344_v39 = vpop.xlane.xlu0 %343  ;;  %737 = vrcp.f32 %v348_v38 }
 0x117   : > { %739 = vrcp.f32 %v344_v39 }
 0x119   : > { %v352_v40 = vpop.xlane.xlu1 %351 }
 0x11a   : > { %741 = vrcp.f32 %v352_v40  ;;  %v350_v41 = vpop.xlane.xlu0 %349 }
 0x11b   : > { %743 = vrcp.f32 %v350_v41 }
 0x11c   : > { %v734_v44 = vpop.eup %733 }
 0x11d   : > { %v356_v42 = vpop.xlane.xlu1 %355  ;;  %v736_v45 = vpop.eup %735  ;;  %v407_v56 = vmul.f32 %v734_v44, %v1189_v1 }
 0x11e   : > { %745 = vrcp.f32 %v356_v42  ;;  %v354_v43 = vpop.xlane.xlu0 %353  ;;  %v405_v60 = vmul.f32 %v736_v45, %v1192_v7 }
 0x11f   : > { %747 = vrcp.f32 %v354_v43 }
 0x120   : > { %v738_v47 = vpop.eup %737 }
 0x121   : > { %v360_v46 = vpop.xlane.xlu1 %359  ;;  %v740_v49 = vpop.eup %739  ;;  %v408_v52 = vmul.f32 %v738_v47, %v1196_v12 }
 0x122   : > { %749 = vrcp.f32 %v360_v46  ;;  %v358_v48 = vpop.xlane.xlu0 %357  ;;  %v406_v54 = vmul.f32 %v740_v49, %v1199_v13 }
 0x123   : > { %751 = vrcp.f32 %v358_v48  ;;  %v428_v62 = vmax.f32 %v407_v56, %v408_v52 }
 0x124   : > { %v742_v50 = vpop.eup %741  ;;  %v421_v2 = vmax.f32 %v405_v60, %v406_v54 }
 0x125   : > { %v744_v51 = vpop.eup %743  ;;  %v364_v53 = vpop.xlane.xlu1 %363  ;;  %v410_v57 = vmul.f32 %v742_v50, %v1204_v20  ;;  %v429_v10 = vrot.slane %v428_v62, 4 }
 0x126   : > { %753 = vrcp.f32 %v364_v53  ;;  %v362_v55 = vpop.xlane.xlu0 %361  ;;  %v409_v58 = vmul.f32 %v744_v51, %v1207_v21  ;;  %v422_v7 = vrot.slane %v421_v2, 4 }
 0x127   : > { %755 = vrcp.f32 %v362_v55  ;;  %v430_v21 = vmax.f32 %v428_v62, %v429_v10 }
 0x128   : > { %v746_v59 = vpop.eup %745  ;;  %v435_v6 = vmax.f32 %v409_v58, %v410_v57  ;;  %v423_v23 = vmax.f32 %v421_v2, %v422_v7 }
 0x129   : > { %v748_v61 = vpop.eup %747  ;;  %v412_v63 = vmul.f32 %v746_v59, %v1209_v24  ;;  %v368_v0 = vpop.xlane.xlu1 %367 }
 0x12a   : > { %v411_v4 = vmul.f32 %v748_v61, %v1213_v26  ;;  %757 = vrcp.f32 %v368_v0  ;;  %v366_v5 = vpop.xlane.xlu0 %365  ;;  %v436_v16 = vrot.slane %v435_v6, 4  ;;  %v424_v38 = vrot.slane %v423_v23, 2 }
 0x12b   : > { %759 = vrcp.f32 %v366_v5 }
 0x12c   : > { %v750_v1 = vpop.eup %749  ;;  %v442_v8 = vmax.f32 %v411_v4, %v412_v63  ;;  %v437_v11 = vmax.f32 %v435_v6, %v436_v16 }
 0x12d   : > { %v752_v9 = vpop.eup %751  ;;  %v414_v12 = vmul.f32 %v750_v1, %v1216_v28  ;;  %v372_v13 = vpop.xlane.xlu1 %371  ;;  %v431_v28 = vrot.slane %v430_v21, 2 }
 0x12e   : > { %v413_v14 = vmul.f32 %v752_v9, %v1219_v29  ;;  %v370_v15 = vpop.xlane.xlu0 %369  ;;  %761 = vrcp.f32 %v372_v13  ;;  %v443_v18 = vrot.slane %v442_v8, 4  ;;  %v438_v40 = vrot.slane %v437_v11, 2 }
 0x12f   : > { %763 = vrcp.f32 %v370_v15  ;;  %v432_v44 = vmax.f32 %v430_v21, %v431_v28 }
 0x130   : > { %v754_v17 = vpop.eup %753  ;;  %v449_v19 = vmax.f32 %v413_v14, %v414_v12  ;;  %v444_v3 = vmax.f32 %v442_v8, %v443_v18  ;;  %v439_v50 = vmax.f32 %v437_v11, %v438_v40 }
 0x131   : > { %v756_v20 = vpop.eup %755  ;;  %v416_v22 = vmul.f32 %v754_v17, %v1222_v30  ;;  %v260_v17 = vld [vmem:[%s1140_s10] sm:$0xff] }
 0x132   : > { %v450_v24 = vrot.slane %v449_v19, 4  ;;  %v415_v25 = vmul.f32 %v756_v20, %v1225_v31  ;;  %v445_v30 = vrot.slane %v444_v3, 2  ;;  %v425_v31 = vmax.f32 %v423_v23, %v424_v38 }
 0x133   : > { %v440_v59 = vrot.slane %v439_v50, 1 }
 0x134   : > { %v758_v26 = vpop.eup %757  ;;  %v451_v29 = vmax.f32 %v449_v19, %v450_v24  ;;  %v456_v36 = vmax.f32 %v415_v25, %v416_v22  ;;  %v446_v52 = vmax.f32 %v444_v3, %v445_v30  ;;  %v426_v55 = vrot.slane %v425_v31, 1 }
 0x135   : > { %v760_v27 = vpop.eup %759  ;;  %v418_v37 = vmul.f32 %v758_v26, %v1228_v32  ;;  %v441_v5 = vmax.f32 %v439_v50, %v440_v59 }
 0x136   : > { %v417_v39 = vmul.f32 %v760_v27, %v1231_v33  ;;  %v457_v41 = vrot.slane %v456_v36, 4  ;;  %v452_v45 = vrot.slane %v451_v29, 2  ;;  %v433_v33 = vrot.slane %v432_v44, 1 }
 0x137   : > { %v447_v60 = vrot.slane %v446_v52, 1 }
 0x138   : > { %v463_v42 = vmax.f32 %v417_v39, %v418_v37  ;;  %v762_v43 = vpop.eup %761  ;;  %v458_v46 = vmax.f32 %v456_v36, %v457_v41  ;;  %v453_v54 = vmax.f32 %v451_v29, %v452_v45  ;;  %v434_v0 = vmax.f32 %v432_v44, %v433_v33 }
 0x139   : > { %v420_v48 = vmul.f32 %v762_v43, %v1234_v34  ;;  %v764_v49 = vpop.eup %763  ;;  %v427_v34 = vmax.f32 %v425_v31, %v426_v55  ;;  %v448_v1 = vmax.f32 %v446_v52, %v447_v60 }
 0x13a   : > { %v464_v47 = vrot.slane %v463_v42, 4  ;;  %v459_v51 = vrot.slane %v458_v46, 2  ;;  %v419_v53 = vmul.f32 %v764_v49, %v1237_v35  ;;  %v454_v63 = vrot.slane %v453_v54, 1 }
 0x13b   : > { %v486_v9 = vsel %vm485_vm0, %v434_v0, %v427_v34 }
 0x13c   : > { %v465_v32 = vmax.f32 %v463_v42, %v464_v47  ;;  %v460_v56 = vmax.f32 %v458_v46, %v459_v51  ;;  %v470_v58 = vmax.f32 %v419_v53, %v420_v48  ;;  %v455_v8 = vmax.f32 %v453_v54, %v454_v63 }
 0x13d   : > { %v488_v7 = vsel %vm487_vm1, %v441_v5, %v486_v9 }
 0x13e   : > { %v466_v57 = vrot.slane %v465_v32, 2  ;;  %v471_v62 = vrot.slane %v470_v58, 4  ;;  %v461_v2 = vrot.slane %v460_v56, 1  ;;  %v490_v15 = vsel %vm489_vm2, %v448_v1, %v488_v7 }
 0x13f   : > { %v492_v16 = vsel %vm491_vm3, %v455_v8, %v490_v15 }
 0x140   : > { %v467_v61 = vmax.f32 %v465_v32, %v466_v57  ;;  %v472_v4 = vmax.f32 %v470_v58, %v471_v62  ;;  %v462_v10 = vmax.f32 %v460_v56, %v461_v2 }
 0x142   : > { %v468_v6 = vrot.slane %v467_v61, 1  ;;  %v473_v35 = vrot.slane %v472_v4, 2  ;;  %v494_v19 = vsel %vm493_vm4, %v462_v10, %v492_v16 }
 0x144   : > { %v474_v12 = vmax.f32 %v472_v4, %v473_v35  ;;  %v469_v13 = vmax.f32 %v467_v61, %v468_v6 }
 0x146   : > { %v475_v14 = vrot.slane %v474_v12, 1  ;;  %v496_v20 = vsel %vm495_vm5, %v469_v13, %v494_v19 }
 0x148   : > { %v476_v18 = vmax.f32 %v474_v12, %v475_v14 }
 0x14a   : > { %v498_v21 = vsel %vm497_vm6, %v476_v18, %v496_v20 }
 0x14b   : > { %v500_v22 = vmul.f32 %v498_v21, %v260_v17 }
 0x14d   : > { %501 = vst [vmem:[%s238_s11] sm:$0xff] %v500_v22 }
 0x14e   : > { %866 = shalt.err (!%p863_p5)
}
 0x14f   : > { %s867_s22 = scalar_lea.hbm %s1264_s6, 128  ;;  %s871_s18 = scalar_lea.hbm %s1311_s3, 256 }
 0x150   : > { %p868_p11 = scmp.ne.s32.totalorder %s1264_s6, %s867_s22  ;;  %p872_p10 = scmp.lt.u32.totalorder %s1264_s6, %s1311_s3 }
 0x151   : > { %p873_p0 = scmp.lt.u32.totalorder %s871_s18, %s867_s22  ;;  %p875_p7 = scmp.lt.u32.totalorder %s867_s22, %s1264_s6 }
 0x152   : > { %p869_p9 = pnand %p868_p11, %p1326_p12 }
 0x153   : > { %p874_p4 = por %p873_p0, %p872_p10 }
 0x154   : > { %p870_p8 = pneg %p869_p9 }
 0x155   : > { %p876_p2 = por %p875_p7, %p874_p4 }
 0x157   : > { %p877_p6 = pnand %p876_p2, %p870_p8 }
 0x159   : > { %880 = shalt.err (!%p877_p6)
}
 0x15a   : > { %645 = dma.vmem_to_hbm [thread:$0]  (%p1326_p12), %s1266_s17, 128, %s1264_s6, %s503_s30  }
 0x15b PF: > { %s528_s28 = sand.u32 1, %s915_s12   ;;  %p1327_p13 = scmp.ne.s32.totalorder %s1319_s27, 0 }
 0x15c   : > { %p1328_p3 = scmp.ge.s32.totalorder %s927_s15, 2  ;;  %s529_s5 = scalar_lea.sflag [#allocation4], %s528_s28 }
 0x15e   : > { %p659_p1 = pnand %p1328_p3, %p1327_p13 }
 0x160   : > { %910 = dma.done.wait (!%p659_p1), %s529_s5, 128  }
 0x161   : > { %912 = vsyncadd (!%p659_p1), %s529_s5, 4294967168  ;;  %p17_p5 = scmp.ge.s32.totalorder %s976_s16, 4   ;;  %s1329_s12 = smov %s919_s13 }
 0x162   : > { %s1330_s13 = smov %s923_s14  ;;  %s1331_s14 = smov %s987_s19 }
 0x163   : > { %s1332_s15 = smov %s976_s16  ;;  %19 = sbr.rel (!%p17_p5) target bundleno = 6 (0x6), region = 92 }
 0x16a   :  { %534 = vsyncpa [#allocation3], 1 }
 0x16b   :  { %536 = vsyncpa [#allocation3 + $0x1], 1 }
 0x16c   :  { %537 = vsyncpa [#allocation6], 1 }
 0x16d   :  { %538 = vsyncpa [#allocation4], 1 }
 0x16e   :  { %540 = vsyncpa [#allocation4 + $0x1], 1 }

</bundles_post_ra>
